<compile_context>
chip_gen: v6e
topology: v6e:2x2x1
jax: 0.10.0
libtpu: 0.0.40
codegen_flags: <defaults>
</compile_context>

<pallas_src>
import math

import jax
import jax.numpy as jnp
from jax import lax
from jax.experimental import pallas as pl
from jax.experimental.pallas import tpu as pltpu

_LANES = 128
_SUBLANES = 8


def _round_up(x, m):
    return ((x + m - 1) // m) * m


def _combined_constraint_kernel(r_ref, det_ref, part_ref):
    # r_ref:    (9, tile_rows, 128)  plane k = 3*i + j holds R[b, i, j], batch lane-dense.
    # det_ref:  (tile_rows, 128)     per-batch |det(R_b) - 1|.
    # part_ref: (1, 8, 128)          row 0: sum_b ortho_sq, row 1: sum_b scaling_sq
    #                                (sublane-reduced per-tile partials; rows 2..7 unused).
    tile_rows = r_ref.shape[1]
    chunk = math.gcd(tile_rows, 64)       # largest divisor of tile_rows that is <= 64
    n_chunks = tile_rows // chunk

    def body(c, carry):
        o_acc, s_acc = carry
        row0 = pl.multiple_of(c * chunk, chunk)
        rows = pl.ds(row0, chunk)

        r00 = r_ref[0, rows, :]
        r01 = r_ref[1, rows, :]
        r02 = r_ref[2, rows, :]
        r10 = r_ref[3, rows, :]
        r11 = r_ref[4, rows, :]
        r12 = r_ref[5, rows, :]
        r20 = r_ref[6, rows, :]
        r21 = r_ref[7, rows, :]
        r22 = r_ref[8, rows, :]

        # Gram = R^T R is symmetric: 6 unique entries only (pure VPU, no MXU).
        g00 = r00 * r00 + r10 * r10 + r20 * r20
        g11 = r01 * r01 + r11 * r11 + r21 * r21
        g22 = r02 * r02 + r12 * r12 + r22 * r22
        g01 = r00 * r01 + r10 * r11 + r20 * r21
        g02 = r00 * r02 + r10 * r12 + r20 * r22
        g12 = r01 * r02 + r11 * r12 + r21 * r22

        d00 = g00 - 1.0
        d11 = g11 - 1.0
        d22 = g22 - 1.0
        # ||R^T R - I||^2 per batch: diagonal terms once, off-diagonal terms twice.
        ortho_sq = (d00 * d00 + d11 * d11 + d22 * d22
                    + 2.0 * (g01 * g01 + g02 * g02 + g12 * g12))

        s0 = r00 - 1.0
        s1 = r11 - 1.0
        s2 = r22 - 1.0
        scaling_sq = s0 * s0 + s1 * s1 + s2 * s2

        det = (r00 * (r11 * r22 - r12 * r21)
               - r01 * (r10 * r22 - r12 * r20)
               + r02 * (r10 * r21 - r11 * r20))
        det_ref[rows, :] = jnp.abs(det - 1.0)

        # Sublane reductions land on the XLU slot (idle otherwise) -> essentially free.
        o_acc = o_acc + jnp.sum(ortho_sq, axis=0, keepdims=True)
        s_acc = s_acc + jnp.sum(scaling_sq, axis=0, keepdims=True)
        return o_acc, s_acc

    zero = jnp.zeros((1, _LANES), jnp.float32)
    o_acc, s_acc = lax.fori_loop(0, n_chunks, body, (zero, zero),
                                 unroll=(n_chunks <= 16))
    part_ref[0, 0:1, :] = o_acc
    part_ref[0, 1:2, :] = s_acc


def _reference(R, ortho_weight=1.0, scaling_weight=1.0, det_weight=1.0):
    """Pure-JAX mirror of the PyTorch forward (also used as the small-B fast path)."""
    R = R.astype(jnp.float32)
    RtR = jnp.einsum('bij,bik->bjk', R, R)
    ortho = jnp.sqrt(jnp.sum((RtR - jnp.eye(3, dtype=jnp.float32)) ** 2))
    diag = jnp.diagonal(R, axis1=1, axis2=2)
    scaling = jnp.sqrt(jnp.sum((diag - 1.0) ** 2))
    det = jnp.linalg.det(R)
    return ortho_weight * ortho + scaling_weight * scaling + det_weight * jnp.abs(det - 1.0)


def combined_constraint_loss(R, ortho_weight=1.0, scaling_weight=1.0, det_weight=1.0,
                             max_tile_rows=512, min_kernel_batch=8192):
    """Pallas implementation of CombinedConstraintLoss.forward. Returns shape (B,).

    max_tile_rows: sublane rows per grid step (x128 batches). 512 fits every
    generation's default scoped VMEM; v6e/v7x callers may pass 1024-2048 (the
    wrapper bumps vmem_limit_bytes automatically when needed).
    """
    B = R.shape[0]
    assert R.shape == (B, 3, 3), f"expected (B, 3, 3), got {R.shape}"

    # Small-B fast path: launch + padding + layout copy dominate; fused XLA wins there.
    if B < min_kernel_batch:
        return _reference(R, ortho_weight, scaling_weight, det_weight)

    # --- tiling -------------------------------------------------------------
    max_tile_rows = _round_up(max(int(max_tile_rows), _SUBLANES), _SUBLANES)
    rows_needed = pl.cdiv(B, _LANES)
    tile_rows = _round_up(rows_needed, _SUBLANES)
    if tile_rows > max_tile_rows:
        tile_rows = max_tile_rows
    elif rows_needed >= 2 * _SUBLANES:
        # Enough work for >= 2 grid steps -> both v7x TensorCores get a tile.
        tile_rows = _round_up(pl.cdiv(rows_needed, 2), _SUBLANES)
    num_tiles = pl.cdiv(rows_needed, tile_rows)
    rows_total = num_tiles * tile_rows
    B_pad = rows_total * _LANES

    # --- wrapper layout: pad (identity rows) BEFORE the single transpose -----
    # Identity padding contributes exactly 0 to every loss term -> no masking needed.
    # TODO(synk): if the producer can emit R already in (9, B) layout, the transpose
    # copy below disappears entirely.
    Rf = R.reshape(B, 9).astype(jnp.float32)
    if B_pad != B:
        eye_rows = jnp.broadcast_to(jnp.eye(3, dtype=jnp.float32).reshape(1, 9),
                                    (B_pad - B, 9))
        Rf = jnp.concatenate([Rf, eye_rows], axis=0)
    r3 = Rf.T.reshape(9, rows_total, _LANES)

    # --- compiler params ------------------------------------------------------
    in_block = 9 * tile_rows * _LANES * 4
    det_block = tile_rows * _LANES * 4
    vmem_est = 2 * (in_block + det_block) + 2 * (8 * _LANES * 4) + (1 << 20)
    cp_kwargs = dict(dimension_semantics=("parallel",))
    if vmem_est > (28 << 20):
        cp_kwargs["vmem_limit_bytes"] = min(vmem_est + (4 << 20), 60 << 20)

    det_out, part_out = pl.pallas_call(
        _combined_constraint_kernel,
        out_shape=(
            jax.ShapeDtypeStruct((rows_total, _LANES), jnp.float32),      # det plane
            jax.ShapeDtypeStruct((num_tiles, 8, _LANES), jnp.float32),    # per-tile partials
        ),
        grid=(num_tiles,),
        in_specs=[pl.BlockSpec((9, tile_rows, _LANES), lambda i: (0, i, 0))],
        out_specs=(
            pl.BlockSpec((tile_rows, _LANES), lambda i: (i, 0)),
            pl.BlockSpec((1, 8, _LANES), lambda i: (i, 0, 0)),
        ),
        compiler_params=pltpu.CompilerParams(**cp_kwargs),
    )(r3)

    # Tiny global reductions over num_tiles*128 partials (padding contributes 0).
    ortho_loss = jnp.sqrt(jnp.sum(part_out[:, 0, :]))
    scaling_loss = jnp.sqrt(jnp.sum(part_out[:, 1, :]))
    det_loss = det_out.reshape(B_pad)[:B]

    return (ortho_weight * ortho_loss
            + scaling_weight * scaling_loss
            + det_weight * det_loss)


if __name__ == "__main__":
    key = jax.random.PRNGKey(0)

    # Force the kernel path (min_kernel_batch=0) so the Pallas kernel is exercised.
    loss_fn = jax.jit(lambda r: combined_constraint_loss(r, min_kernel_batch=0))

    # Small, spec-consistent shape (B=2).
    R_small = jax.random.normal(key, (2, 3, 3), dtype=jnp.float32)
    out_small = jax.block_until_ready(loss_fn(R_small))
    ref_small = jax.block_until_ready(_reference(R_small))
    assert out_small.shape == (2,), f"bad output shape: {out_small.shape}"
    assert jnp.allclose(out_small, ref_small, rtol=1e-5, atol=1e-5), \
        f"mismatch (small): {out_small} vs {ref_small}"

    # Larger batch: exercises multi-tile grid, in-kernel chunk loop and partial sums.
    R_big = jax.random.normal(jax.random.PRNGKey(1), (20000, 3, 3), dtype=jnp.float32)
    out_big = jax.block_until_ready(loss_fn(R_big))
    ref_big = jax.block_until_ready(_reference(R_big))
    assert out_big.shape == (20000,), f"bad output shape: {out_big.shape}"
    assert jnp.allclose(out_big, ref_big, rtol=1e-4, atol=1e-4), \
        "mismatch (large batch)"

    print("KERNEL_OK")
</pallas_src>

<mosaic_0001>
module attributes {stable_mosaic.version = 11 : i64} {
  func.func @_combined_constraint_kernel(%arg0: i32, %arg1: memref<9x8x128xf32, #tpu.memory_space<vmem>>, %arg2: memref<8x128xf32, #tpu.memory_space<vmem>>, %arg3: memref<1x8x128xf32, #tpu.memory_space<vmem>>) attributes {dimension_semantics = [#tpu.dimension_semantics<parallel>], iteration_bounds = array<i64: 1>, scalar_prefetch = 0 : i64, scratch_operands = 0 : i64, tpu.core_type = #tpu.core_type<tc>, window_params = [{transform_indices = @transform_0, window_bounds = array<i64: 9, 8, 128>}, {transform_indices = @transform_1, window_bounds = array<i64: 8, 128>}, {transform_indices = @transform_2, window_bounds = array<i64: 1, 8, 128>}]} {
    %cst = arith.constant 0.000000e+00 : f32
    %0 = vector.broadcast %cst : f32 to vector<1x128xf32>
    %c0_i32 = arith.constant 0 : i32
    %c8_i32 = arith.constant 8 : i32
    %1 = arith.muli %c0_i32, %c8_i32 : i32
    %2 = tpu.assume_multiple %1, 8 : i32
    %c0 = arith.constant 0 : index
    %3 = arith.index_cast %2 : i32 to index
    %c0_0 = arith.constant 0 : index
    %4 = vector.load %arg1[%c0, %3, %c0_0] : memref<9x8x128xf32, #tpu.memory_space<vmem>>, vector<1x8x128xf32>
    %5 = vector.shape_cast %4 : vector<1x8x128xf32> to vector<8x128xf32>
    %c1 = arith.constant 1 : index
    %6 = arith.index_cast %2 : i32 to index
    %c0_1 = arith.constant 0 : index
    %7 = vector.load %arg1[%c1, %6, %c0_1] : memref<9x8x128xf32, #tpu.memory_space<vmem>>, vector<1x8x128xf32>
    %8 = vector.shape_cast %7 : vector<1x8x128xf32> to vector<8x128xf32>
    %c2 = arith.constant 2 : index
    %9 = arith.index_cast %2 : i32 to index
    %c0_2 = arith.constant 0 : index
    %10 = vector.load %arg1[%c2, %9, %c0_2] : memref<9x8x128xf32, #tpu.memory_space<vmem>>, vector<1x8x128xf32>
    %11 = vector.shape_cast %10 : vector<1x8x128xf32> to vector<8x128xf32>
    %c3 = arith.constant 3 : index
    %12 = arith.index_cast %2 : i32 to index
    %c0_3 = arith.constant 0 : index
    %13 = vector.load %arg1[%c3, %12, %c0_3] : memref<9x8x128xf32, #tpu.memory_space<vmem>>, vector<1x8x128xf32>
    %14 = vector.shape_cast %13 : vector<1x8x128xf32> to vector<8x128xf32>
    %c4 = arith.constant 4 : index
    %15 = arith.index_cast %2 : i32 to index
    %c0_4 = arith.constant 0 : index
    %16 = vector.load %arg1[%c4, %15, %c0_4] : memref<9x8x128xf32, #tpu.memory_space<vmem>>, vector<1x8x128xf32>
    %17 = vector.shape_cast %16 : vector<1x8x128xf32> to vector<8x128xf32>
    %c5 = arith.constant 5 : index
    %18 = arith.index_cast %2 : i32 to index
    %c0_5 = arith.constant 0 : index
    %19 = vector.load %arg1[%c5, %18, %c0_5] : memref<9x8x128xf32, #tpu.memory_space<vmem>>, vector<1x8x128xf32>
    %20 = vector.shape_cast %19 : vector<1x8x128xf32> to vector<8x128xf32>
    %c6 = arith.constant 6 : index
    %21 = arith.index_cast %2 : i32 to index
    %c0_6 = arith.constant 0 : index
    %22 = vector.load %arg1[%c6, %21, %c0_6] : memref<9x8x128xf32, #tpu.memory_space<vmem>>, vector<1x8x128xf32>
    %23 = vector.shape_cast %22 : vector<1x8x128xf32> to vector<8x128xf32>
    %c7 = arith.constant 7 : index
    %24 = arith.index_cast %2 : i32 to index
    %c0_7 = arith.constant 0 : index
    %25 = vector.load %arg1[%c7, %24, %c0_7] : memref<9x8x128xf32, #tpu.memory_space<vmem>>, vector<1x8x128xf32>
    %26 = vector.shape_cast %25 : vector<1x8x128xf32> to vector<8x128xf32>
    %c8 = arith.constant 8 : index
    %27 = arith.index_cast %2 : i32 to index
    %c0_8 = arith.constant 0 : index
    %28 = vector.load %arg1[%c8, %27, %c0_8] : memref<9x8x128xf32, #tpu.memory_space<vmem>>, vector<1x8x128xf32>
    %29 = vector.shape_cast %28 : vector<1x8x128xf32> to vector<8x128xf32>
    %30 = arith.mulf %5, %5 : vector<8x128xf32>
    %31 = arith.mulf %14, %14 : vector<8x128xf32>
    %32 = arith.addf %30, %31 : vector<8x128xf32>
    %33 = arith.mulf %23, %23 : vector<8x128xf32>
    %34 = arith.addf %32, %33 : vector<8x128xf32>
    %35 = arith.mulf %8, %8 : vector<8x128xf32>
    %36 = arith.mulf %17, %17 : vector<8x128xf32>
    %37 = arith.addf %35, %36 : vector<8x128xf32>
    %38 = arith.mulf %26, %26 : vector<8x128xf32>
    %39 = arith.addf %37, %38 : vector<8x128xf32>
    %40 = arith.mulf %11, %11 : vector<8x128xf32>
    %41 = arith.mulf %20, %20 : vector<8x128xf32>
    %42 = arith.addf %40, %41 : vector<8x128xf32>
    %43 = arith.mulf %29, %29 : vector<8x128xf32>
    %44 = arith.addf %42, %43 : vector<8x128xf32>
    %45 = arith.mulf %5, %8 : vector<8x128xf32>
    %46 = arith.mulf %14, %17 : vector<8x128xf32>
    %47 = arith.addf %45, %46 : vector<8x128xf32>
    %48 = arith.mulf %23, %26 : vector<8x128xf32>
    %49 = arith.addf %47, %48 : vector<8x128xf32>
    %50 = arith.mulf %5, %11 : vector<8x128xf32>
    %51 = arith.mulf %14, %20 : vector<8x128xf32>
    %52 = arith.addf %50, %51 : vector<8x128xf32>
    %53 = arith.mulf %23, %29 : vector<8x128xf32>
    %54 = arith.addf %52, %53 : vector<8x128xf32>
    %55 = arith.mulf %8, %11 : vector<8x128xf32>
    %56 = arith.mulf %17, %20 : vector<8x128xf32>
    %57 = arith.addf %55, %56 : vector<8x128xf32>
    %58 = arith.mulf %26, %29 : vector<8x128xf32>
    %59 = arith.addf %57, %58 : vector<8x128xf32>
    %cst_9 = arith.constant 1.000000e+00 : f32
    %60 = vector.broadcast %cst_9 : f32 to vector<8x128xf32>
    %61 = arith.subf %34, %60 : vector<8x128xf32>
    %cst_10 = arith.constant 1.000000e+00 : f32
    %62 = vector.broadcast %cst_10 : f32 to vector<8x128xf32>
    %63 = arith.subf %39, %62 : vector<8x128xf32>
    %cst_11 = arith.constant 1.000000e+00 : f32
    %64 = vector.broadcast %cst_11 : f32 to vector<8x128xf32>
    %65 = arith.subf %44, %64 : vector<8x128xf32>
    %66 = arith.mulf %61, %61 : vector<8x128xf32>
    %67 = arith.mulf %63, %63 : vector<8x128xf32>
    %68 = arith.addf %66, %67 : vector<8x128xf32>
    %69 = arith.mulf %65, %65 : vector<8x128xf32>
    %70 = arith.addf %68, %69 : vector<8x128xf32>
    %71 = arith.mulf %49, %49 : vector<8x128xf32>
    %72 = arith.mulf %54, %54 : vector<8x128xf32>
    %73 = arith.addf %71, %72 : vector<8x128xf32>
    %74 = arith.mulf %59, %59 : vector<8x128xf32>
    %75 = arith.addf %73, %74 : vector<8x128xf32>
    %cst_12 = arith.constant 2.000000e+00 : f32
    %76 = vector.broadcast %cst_12 : f32 to vector<8x128xf32>
    %77 = arith.mulf %76, %75 : vector<8x128xf32>
    %78 = arith.addf %70, %77 : vector<8x128xf32>
    %cst_13 = arith.constant 1.000000e+00 : f32
    %79 = vector.broadcast %cst_13 : f32 to vector<8x128xf32>
    %80 = arith.subf %5, %79 : vector<8x128xf32>
    %cst_14 = arith.constant 1.000000e+00 : f32
    %81 = vector.broadcast %cst_14 : f32 to vector<8x128xf32>
    %82 = arith.subf %17, %81 : vector<8x128xf32>
    %cst_15 = arith.constant 1.000000e+00 : f32
    %83 = vector.broadcast %cst_15 : f32 to vector<8x128xf32>
    %84 = arith.subf %29, %83 : vector<8x128xf32>
    %85 = arith.mulf %80, %80 : vector<8x128xf32>
    %86 = arith.mulf %82, %82 : vector<8x128xf32>
    %87 = arith.addf %85, %86 : vector<8x128xf32>
    %88 = arith.mulf %84, %84 : vector<8x128xf32>
    %89 = arith.addf %87, %88 : vector<8x128xf32>
    %90 = arith.mulf %17, %29 : vector<8x128xf32>
    %91 = arith.mulf %20, %26 : vector<8x128xf32>
    %92 = arith.subf %90, %91 : vector<8x128xf32>
    %93 = arith.mulf %5, %92 : vector<8x128xf32>
    %94 = arith.mulf %14, %29 : vector<8x128xf32>
    %95 = arith.mulf %20, %23 : vector<8x128xf32>
    %96 = arith.subf %94, %95 : vector<8x128xf32>
    %97 = arith.mulf %8, %96 : vector<8x128xf32>
    %98 = arith.subf %93, %97 : vector<8x128xf32>
    %99 = arith.mulf %14, %26 : vector<8x128xf32>
    %100 = arith.mulf %17, %23 : vector<8x128xf32>
    %101 = arith.subf %99, %100 : vector<8x128xf32>
    %102 = arith.mulf %11, %101 : vector<8x128xf32>
    %103 = arith.addf %98, %102 : vector<8x128xf32>
    %cst_16 = arith.constant 1.000000e+00 : f32
    %104 = vector.broadcast %cst_16 : f32 to vector<8x128xf32>
    %105 = arith.subf %103, %104 : vector<8x128xf32>
    %106 = math.absf %105 : vector<8x128xf32>
    %107 = arith.index_cast %2 : i32 to index
    %c0_17 = arith.constant 0 : index
    %108 = vector.load %arg2[%107, %c0_17] : memref<8x128xf32, #tpu.memory_space<vmem>>, vector<8x128xf32>
    tpu.vector_store %arg2[%107, %c0_17], %106 {strides = array<i32>} : memref<8x128xf32, #tpu.memory_space<vmem>>, vector<8x128xf32>,
    %cst_18 = arith.constant dense<0.000000e+00> : vector<128xf32>
    %109 = vector.multi_reduction <add>, %78, %cst_18 [0] : vector<8x128xf32> to vector<128xf32>
    %110 = vector.shape_cast %109 : vector<128xf32> to vector<1x128xf32>
    %111 = arith.addf %0, %110 : vector<1x128xf32>
    %cst_19 = arith.constant dense<0.000000e+00> : vector<128xf32>
    %112 = vector.multi_reduction <add>, %89, %cst_19 [0] : vector<8x128xf32> to vector<128xf32>
    %113 = vector.shape_cast %112 : vector<128xf32> to vector<1x128xf32>
    %114 = arith.addf %0, %113 : vector<1x128xf32>
    %c1_i32 = arith.constant 1 : i32
    %c0_20 = arith.constant 0 : index
    %c0_21 = arith.constant 0 : index
    %c0_22 = arith.constant 0 : index
    %115 = vector.load %arg3[%c0_20, %c0_21, %c0_22] : memref<1x8x128xf32, #tpu.memory_space<vmem>>, vector<1x1x128xf32>
    %116 = vector.shape_cast %115 : vector<1x1x128xf32> to vector<1x128xf32>
    %117 = vector.shape_cast %111 : vector<1x128xf32> to vector<1x1x128xf32>
    tpu.vector_store %arg3[%c0_20, %c0_21, %c0_22], %117 {strides = array<i32>} : memref<1x8x128xf32, #tpu.memory_space<vmem>>, vector<1x1x128xf32>,
    %c0_23 = arith.constant 0 : index
    %c1_24 = arith.constant 1 : index
    %c0_25 = arith.constant 0 : index
    %118 = vector.load %arg3[%c0_23, %c1_24, %c0_25] : memref<1x8x128xf32, #tpu.memory_space<vmem>>, vector<1x1x128xf32>
    %119 = vector.shape_cast %118 : vector<1x1x128xf32> to vector<1x128xf32>
    %120 = vector.shape_cast %114 : vector<1x128xf32> to vector<1x1x128xf32>
    tpu.vector_store %arg3[%c0_23, %c1_24, %c0_25], %120 {strides = array<i32>} : memref<1x8x128xf32, #tpu.memory_space<vmem>>, vector<1x1x128xf32>,
    return
  }
  func.func @transform_0(%arg0: i32) -> (i32, i32, i32) {
    %c0_i32 = arith.constant 0 : i32
    %c0_i32_0 = arith.constant 0 : i32
    %c0_i32_1 = arith.constant 0 : i32
    return %c0_i32, %arg0, %c0_i32_0 : i32, i32, i32
  }
  func.func @transform_1(%arg0: i32) -> (i32, i32) {
    %c0_i32 = arith.constant 0 : i32
    %c0_i32_0 = arith.constant 0 : i32
    return %arg0, %c0_i32 : i32, i32
  }
  func.func @transform_2(%arg0: i32) -> (i32, i32, i32) {
    %c0_i32 = arith.constant 0 : i32
    %c0_i32_0 = arith.constant 0 : i32
    %c0_i32_1 = arith.constant 0 : i32
    return %arg0, %c0_i32, %c0_i32_0 : i32, i32, i32
  }
}

</mosaic_0001>

<bundles_post_ra>
// kernel: _lambda_.1
= control target key start
LH: loop header
LB: loop body
LE: loop exit
PB: predicated region body
PF: predicated region fallthrough
CT: control target
= control target key end

     0   :  { %s203_s0 = inlined_call_operand.vmem [shape: f32[9,8,128], index: 0, kind: input, shape index: {}]   ;;  %s204_s1 = inlined_call_operand.vmem [shape: f32[8,128], index: 1, kind: output, shape index: {0}]   ;;  %s205_s2 = inlined_call_operand.vmem [shape: f32[1,8,128], index: 2, kind: output, shape index: {1}]  }
   0x1   :  { %v10_v0 = vld [vmem:[%s203_s0] sm:$0xff]  ;;  %v137_v1 = vld [vmem:[%s203_s0 + $0x8] sm:$0xff]  ;;  %v138_v2 = vld [vmem:[%s203_s0 + $0x10] sm:$0xff] }
   0x2   :  { %v139_v3 = vld [vmem:[%s203_s0 + $0x18] sm:$0xff]  ;;  %v140_v4 = vld [vmem:[%s203_s0 + $0x20] sm:$0xff]  ;;  %v141_v5 = vld [vmem:[%s203_s0 + $0x28] sm:$0xff]  ;;  %v40_v6 = vmul.f32 %v137_v1, %v137_v1  ;;  %v45_v7 = vmul.f32 %v138_v2, %v138_v2  ;;  %v50_v8 = vmul.f32 %v137_v1, %v10_v0  ;;  %v55_v9 = vmul.f32 %v138_v2, %v10_v0 }
   0x3   :  { %v142_v10 = vld [vmem:[%s203_s0 + $0x30] sm:$0xff]  ;;  %v143_v11 = vld [vmem:[%s203_s0 + $0x38] sm:$0xff]  ;;  %v144_v12 = vld [vmem:[%s203_s0 + $0x40] sm:$0xff]  ;;  %v56_v13 = vmul.f32 %v141_v5, %v139_v3  ;;  %v60_v14 = vmul.f32 %v138_v2, %v137_v1  ;;  %v35_v15 = vmul.f32 %v10_v0, %v10_v0  ;;  %v36_v16 = vmul.f32 %v139_v3, %v139_v3 }
   0x4   :  { %v88_v17 = vmul.f32 %v144_v12, %v140_v4  ;;  %v89_v18 = vmul.f32 %v143_v11, %v141_v5  ;;  %v92_v19 = vmul.f32 %v144_v12, %v139_v3  ;;  %v93_v20 = vmul.f32 %v142_v10, %v141_v5 }
   0x5   :  { %v57_v21 = vadd.f32 %v56_v13, %v55_v9  ;;  %v97_v22 = vmul.f32 %v143_v11, %v139_v3  ;;  %v98_v23 = vmul.f32 %v142_v10, %v140_v4  ;;  %v37_v24 = vadd.f32 %v36_v16, %v35_v15 }
   0x6   :  { %v90_v25 = vsub.f32 %v88_v17, %v89_v18  ;;  %v94_v26 = vsub.f32 %v92_v19, %v93_v20  ;;  %v38_v27 = vmul.f32 %v142_v10, %v142_v10  ;;  %v41_v28 = vmul.f32 %v140_v4, %v140_v4 }
   0x7   :  { %v99_v29 = vsub.f32 %v97_v22, %v98_v23  ;;  %v43_v30 = vmul.f32 %v143_v11, %v143_v11  ;;  %v46_v31 = vmul.f32 %v141_v5, %v141_v5  ;;  %v48_v32 = vmul.f32 %v144_v12, %v144_v12 }
   0x8   :  { %v91_v33 = vmul.f32 %v90_v25, %v10_v0  ;;  %v95_v34 = vmul.f32 %v137_v1, %v94_v26  ;;  %v39_v35 = vadd.f32 %v38_v27, %v37_v24  ;;  %v42_v36 = vadd.f32 %v41_v28, %v40_v6 }
   0x9   :  { %v100_v37 = vmul.f32 %v138_v2, %v99_v29  ;;  %v47_v38 = vadd.f32 %v46_v31, %v45_v7  ;;  %v51_v39 = vmul.f32 %v140_v4, %v139_v3  ;;  %v53_v40 = vmul.f32 %v143_v11, %v142_v10 }
   0xa   :  { %v96_v41 = vsub.f32 %v91_v33, %v95_v34  ;;  %v44_v42 = vadd.f32 %v43_v30, %v42_v36  ;;  %v58_v43 = vmul.f32 %v144_v12, %v142_v10  ;;  %v61_v44 = vmul.f32 %v141_v5, %v140_v4 }
   0xb   :  { %v49_v45 = vadd.f32 %v48_v32, %v47_v38  ;;  %v52_v46 = vadd.f32 %v51_v39, %v50_v8  ;;  %v63_v47 = vmul.f32 %v144_v12, %v143_v11  ;;  %v145_v48 = vadd.f32 -1.0, %v39_v35 }
   0xc   :  { %v101_v49 = vadd.f32 %v100_v37, %v96_v41  ;;  %v59_v50 = vadd.f32 %v58_v43, %v57_v21  ;;  %v62_v51 = vadd.f32 %v61_v44, %v60_v14  ;;  %v146_v52 = vadd.f32 -1.0, %v44_v42 }
   0xd   :  { %v54_v53 = vadd.f32 %v53_v40, %v52_v46  ;;  %v147_v54 = vadd.f32 -1.0, %v49_v45  ;;  %v68_v55 = vmul.f32 %v145_v48, %v145_v48  ;;  %v148_v56 = vadd.f32 -1.0, %v10_v0 }
   0xe   :  { %v151_v57 = vadd.f32 -1.0, %v101_v49  ;;  %v64_v58 = vadd.f32 %v63_v47, %v62_v51  ;;  %v69_v59 = vmul.f32 %v146_v52, %v146_v52  ;;  %v74_v60 = vmul.f32 %v59_v50, %v59_v50 }
   0xf   :  { %v71_v61 = vmul.f32 %v147_v54, %v147_v54  ;;  %v73_v62 = vmul.f32 %v54_v53, %v54_v53  ;;  %v149_v63 = vadd.f32 -1.0, %v140_v4  ;;  %v150_v1 = vadd.f32 -1.0, %v144_v12 }
  0x10   :  { %v103_v2 = vand.u32 2147483647, %v151_v57  ;;  %v70_v3 = vadd.f32 %v69_v59, %v68_v55  ;;  %v76_v5 = vmul.f32 %v64_v58, %v64_v58  ;;  %v83_v6 = vmul.f32 %v148_v56, %v148_v56 }
  0x11   :  { %v75_v7 = vadd.f32 %v74_v60, %v73_v62  ;;  %v84_v8 = vmul.f32 %v149_v63, %v149_v63  ;;  %v86_v9 = vmul.f32 %v150_v1, %v150_v1 }
  0x12   :  { %104 = vst [vmem:[%s204_s1] sm:$0xff] %v103_v2  ;;  %v72_v0 = vadd.f32 %v71_v61, %v70_v3 }
  0x13   :  { %v77_v10 = vadd.f32 %v76_v5, %v75_v7  ;;  %v85_v11 = vadd.f32 %v84_v8, %v83_v6 }
  0x15   :  { %v78_v13 = vmul.f32 2.0, %v77_v10  ;;  %v87_v14 = vadd.f32 %v86_v9, %v85_v11 }
  0x17   :  { %v79_v15 = vadd.f32 %v78_v13, %v72_v0  ;;  %v112_v16 = vrot.slane %v87_v14, 4 }
  0x19   :  { %v105_v4 = vrot.slane %v79_v15, 4  ;;  %v113_v12 = vadd.f32 %v112_v16, %v87_v14 }
  0x1b   :  { %v106_v17 = vadd.f32 %v105_v4, %v79_v15  ;;  %v114_v18 = vrot.slane %v113_v12, 2 }
  0x1d   :  { %v107_v19 = vrot.slane %v106_v17, 2  ;;  %v115_v20 = vadd.f32 %v114_v18, %v113_v12 }
  0x1f   :  { %v108_v21 = vadd.f32 %v107_v19, %v106_v17  ;;  %v116_v22 = vrot.slane %v115_v20, 1 }
  0x21   :  { %v109_v23 = vrot.slane %v108_v21, 1  ;;  %v117_v24 = vadd.f32 %v116_v22, %v115_v20 }
  0x23   :  { %v110_v25 = vadd.f32 %v109_v23, %v108_v21  ;;  %120 = vst [vmem:[%s205_s2 + $0x1] sm:$0x1] %v117_v24 }
  0x25   :  { %119 = vst [vmem:[%s205_s2] sm:$0x1] %v110_v25 }

</bundles_post_ra>
